<compile_context>
chip_gen: v5e
topology: v5e:2x2
jax: 0.10.0
libtpu: 0.0.40
codegen_flags: <defaults>
</compile_context>

<pallas_src>
import functools

import jax
import jax.numpy as jnp
from jax.experimental import pallas as pl
from jax.experimental.pallas import tpu as pltpu

LN_EPS = 1e-5  # nn.LayerNorm default


def _round_up(x, m):
    return ((x + m - 1) // m) * m


def _cdiv(a, b):
    return -(-a // b)


def _pad2d(a, shape, dtype):
    out = jnp.zeros(shape, dtype)
    return out.at[: a.shape[0], : a.shape[1]].set(a.astype(dtype))


def _block_diag(w, seg_in, seg_out, p, dtype):
    """p copies of the (seg_in, seg_out)-padded weight on the diagonal."""
    blk = _pad2d(w, (seg_in, seg_out), dtype)
    return jnp.kron(jnp.eye(p, dtype=dtype), blk)          # (p*seg_in, p*seg_out)


def _ln_mean_matrix(h, seg, p):
    """Segmented-averaging matrix: (z @ M) broadcasts, to every lane of a SEG-lane
    segment, the mean over that segment's first `h` (real) lanes."""
    blk = jnp.zeros((seg, seg), jnp.float32).at[:h, :].set(1.0 / h)
    return jnp.kron(jnp.eye(p, dtype=jnp.float32), blk)    # (p*seg, p*seg)


def _pack_ln_params(b, g, be, seg, p):
    """Pack (bias, gamma, beta) -> (3, p*seg) f32; zero padding keeps dead lanes at 0."""
    rows = []
    for v in (b, g, be):
        v = _pad2d(v.reshape(1, -1), (1, seg), jnp.float32)
        rows.append(jnp.tile(v, (1, p)))
    return jnp.concatenate(rows, axis=0)


def tabular_mlp_kernel(*refs, n_hidden, compute_dtype):
    """Fused (Linear -> LayerNorm -> ReLU) x n_hidden -> Linear on one lane-packed tile.

    refs = (x, [w_bd, ln_mean_mat, ln_params] * n_hidden, wo_bd, bo, out).
    Dropout(p=0.25) is identity in eval mode -> no-op.
    """
    x_ref = refs[0]
    out_ref = refs[-1]
    h = x_ref[...]                                          # (tb, LANES), compute dtype
    for l in range(n_hidden):
        w_ref, m_ref, p_ref = refs[1 + 3 * l: 4 + 3 * l]
        # Linear on the MXU (block-diagonal weight), f32 accumulation.
        z = jnp.dot(h, w_ref[...], preferred_element_type=jnp.float32)
        z = z + p_ref[0:1, :]                               # bias (tiled per segment)
        # Two-pass LayerNorm per SEG-lane segment; segmented mean/var via MXU matmuls
        # against the fixed block-diagonal averaging matrix (MXU has slack, VPU doesn't).
        mean = jnp.dot(z, m_ref[...], preferred_element_type=jnp.float32)
        c = z - mean
        var = jnp.dot(c * c, m_ref[...], preferred_element_type=jnp.float32)
        y = c * jax.lax.rsqrt(var + LN_EPS)
        y = y * p_ref[1:2, :] + p_ref[2:3, :]               # gamma, beta (0 on pad lanes)
        # ReLU; dropout is identity in eval mode.
        h = jnp.maximum(y, 0.0).astype(compute_dtype)
    wo_ref, bo_ref = refs[1 + 3 * n_hidden], refs[2 + 3 * n_hidden]
    out_ref[...] = (
        jnp.dot(h, wo_ref[...], preferred_element_type=jnp.float32) + bo_ref[...]
    )


def tabular_mlp_forward(x, params, *, block_b=4096, use_bf16=True, core_parallel=False):
    """Fused TabularMLP forward.

    x: (B, in_features) f32.
    params: flat tuple (w_0, b_0, gamma_0, beta_0, ..., w_out, b_out); weights are
            (in_features, out_features) so each layer computes X @ W + b.
    block_b: batch rows per grid step (swept default 4096).
    core_parallel: on v7x, shard batch tiles across the 2 TensorCores.
    """
    assert len(params) >= 6 and (len(params) - 2) % 4 == 0
    n_hidden = (len(params) - 2) // 4
    hidden = [params[4 * l: 4 * l + 4] for l in range(n_hidden)]
    wo, bo = params[-2], params[-1]

    B, F = x.shape
    h_sizes = [w.shape[1] for (w, _, _, _) in hidden]
    out_dim = wo.shape[1]
    compute_dtype = jnp.bfloat16 if use_bf16 else jnp.float32

    # ---- lane-packing geometry -------------------------------------------------------
    max_feat = max([F] + h_sizes)
    if max_feat <= 128:
        seg = max(1, pl.next_power_of_2(max_feat))
        p = 128 // seg                      # batch rows packed per 128-lane row
    else:                                   # wide layers: no packing, just pad to 128k
        seg = _round_up(max_feat, 128)
        p = 1
    lanes = p * seg
    out_lanes = p * out_dim

    # ---- pack weights / LN params (tiny, done once per call) --------------------------
    args = []
    for (w, b, g, be), h in zip(hidden, h_sizes):
        args.append(_block_diag(w, seg, seg, p, compute_dtype))   # (lanes, lanes)
        args.append(_ln_mean_matrix(h, seg, p))                   # (lanes, lanes) f32
        args.append(_pack_ln_params(b, g, be, seg, p))            # (3, lanes)     f32
    args.append(_block_diag(wo, seg, out_dim, p, compute_dtype))  # (lanes, out_lanes)
    args.append(jnp.tile(_pad2d(bo.reshape(1, -1), (1, out_dim), jnp.float32), (1, p)))

    # ---- pack x: cast + pad + pack fused into ONE wrapper pass over x ------------------
    b_pad = _round_up(B, p)
    xp = x.astype(compute_dtype)
    xp = jnp.pad(xp, ((0, b_pad - B), (0, seg - F)))
    rows = b_pad // p
    xp = xp.reshape(rows, lanes)            # row r = batch rows [p*r, p*r+p) concatenated

    # ---- batch tiling ------------------------------------------------------------------
    tb = max(8, min(_round_up(_cdiv(block_b, p), 8), _round_up(rows, 8)))
    if core_parallel:
        # need >=2 grid steps for the 2 TensorCores to both get work
        while _cdiv(rows, tb) < 2 and tb > 8:
            tb = max(8, _round_up(tb // 2, 8))
    rows_total = _round_up(rows, tb)
    xp = jnp.pad(xp, ((0, rows_total - rows), (0, 0)))      # zero rows are LN-safe
    grid = (rows_total // tb,)

    const = lambda i: (0, 0)                # weights / LN matrices stay VMEM-resident
    in_specs = [pl.BlockSpec((tb, lanes), lambda i: (i, 0))]
    for _ in range(n_hidden):
        in_specs += [pl.BlockSpec((lanes, lanes), const),
                     pl.BlockSpec((lanes, lanes), const),
                     pl.BlockSpec((3, lanes), const)]
    in_specs += [pl.BlockSpec((lanes, out_lanes), const),
                 pl.BlockSpec((1, out_lanes), const)]
    out_spec = pl.BlockSpec((tb, out_lanes), lambda i: (i, 0))

    itemsize = jnp.dtype(compute_dtype).itemsize
    weight_bytes = sum(int(a.size) * jnp.dtype(a.dtype).itemsize for a in args)
    flops = rows_total * (6 * n_hidden * lanes * lanes + 2 * lanes * out_lanes)
    cost = pl.CostEstimate(
        flops=int(flops),
        transcendentals=int(rows_total * p * n_hidden),     # one rsqrt per row per LN
        bytes_accessed=int(rows_total * lanes * itemsize
                           + rows_total * out_lanes * 4
                           + weight_bytes),
    )

    dim_sem = (pltpu.CORE_PARALLEL,) if core_parallel else ("parallel",)
    out_packed = pl.pallas_call(
        functools.partial(tabular_mlp_kernel, n_hidden=n_hidden,
                          compute_dtype=compute_dtype),
        out_shape=jax.ShapeDtypeStruct((rows_total, out_lanes), jnp.float32),
        grid=grid,
        in_specs=in_specs,
        out_specs=out_spec,
        compiler_params=pltpu.CompilerParams(
            dimension_semantics=dim_sem,
            # headroom for large batch tiles (v5e's scoped default is only 16 MiB)
            vmem_limit_bytes=48 * 1024 * 1024,
        ),
        cost_estimate=cost,
    )(xp, *args)

    # Un-pack: (rows_total, p*out_dim) is batch-major, so this reshape is contiguous/free.
    return out_packed.reshape(rows_total * p, out_dim)[:B]


def init_params(key, in_features, layer_sizes, out_features):
    """Deterministic init mimicking PyTorch nn.Linear (uniform +-1/sqrt(fan_in))."""
    params = []
    fan_in = in_features
    for h in layer_sizes:
        key, kw, kb = jax.random.split(key, 3)
        bound = 1.0 / jnp.sqrt(fan_in)
        w = jax.random.uniform(kw, (fan_in, h), jnp.float32, -bound, bound)
        b = jax.random.uniform(kb, (1, h), jnp.float32, -bound, bound)
        params += [w, b,
                   jnp.ones((1, h), jnp.float32),    # LayerNorm weight
                   jnp.zeros((1, h), jnp.float32)]   # LayerNorm bias
        fan_in = h
    key, kw, kb = jax.random.split(key, 3)
    bound = 1.0 / jnp.sqrt(fan_in)
    wo = jax.random.uniform(kw, (fan_in, out_features), jnp.float32, -bound, bound)
    bo = jax.random.uniform(kb, (1, out_features), jnp.float32, -bound, bound)
    params += [wo, bo]
    return tuple(params)


def reference_forward(x, params):
    """Pure-JAX f32 reference (two-pass LayerNorm, matches the PyTorch module)."""
    n_hidden = (len(params) - 2) // 4
    h = x
    for l in range(n_hidden):
        w, b, g, be = params[4 * l: 4 * l + 4]
        h = h @ w + b
        mean = jnp.mean(h, axis=-1, keepdims=True)
        var = jnp.mean((h - mean) ** 2, axis=-1, keepdims=True)
        h = (h - mean) * jax.lax.rsqrt(var + LN_EPS)
        h = h * g + be
        h = jnp.maximum(h, 0.0)
    return h @ params[-2] + params[-1]


if __name__ == "__main__":
    # Small shapes consistent with the module: tabular input (B, F),
    # layer_sizes=(32, 32), out_shape=8.
    batch, in_features, out_features = 16, 32, 8
    layer_sizes = (32, 32)

    key = jax.random.PRNGKey(0)
    key, kx = jax.random.split(key)
    x = jax.random.normal(kx, (batch, in_features), jnp.float32)
    params = init_params(key, in_features, layer_sizes, out_features)
    ref = reference_forward(x, params)

    # f32 matmul path: tight tolerance against the reference (semantics check).
    out_f32 = jax.block_until_ready(tabular_mlp_forward(x, params, use_bf16=False))
    assert out_f32.shape == (batch, out_features)
    assert jnp.allclose(out_f32, ref, atol=1e-3, rtol=1e-3)

    # Default fast path (bf16 MXU operands, f32 accumulation): looser tolerance.
    out = jax.block_until_ready(tabular_mlp_forward(x, params))
    assert out.shape == (batch, out_features)
    assert jnp.allclose(out, ref, atol=1e-1, rtol=1e-1)

    # Ragged case: exercises batch / feature / hidden padding and a multi-step grid.
    b2, f2, o2, ls2 = 250, 20, 5, (24, 28)
    key, kx2 = jax.random.split(key)
    x2 = jax.random.normal(kx2, (b2, f2), jnp.float32)
    params2 = init_params(key, f2, ls2, o2)
    ref2 = reference_forward(x2, params2)
    out2 = jax.block_until_ready(
        tabular_mlp_forward(x2, params2, use_bf16=False, block_b=128))
    assert out2.shape == (b2, o2)
    assert jnp.allclose(out2, ref2, atol=1e-3, rtol=1e-3)

    print("KERNEL_OK")
</pallas_src>

<mosaic_0001>
module attributes {stable_mosaic.version = 11 : i64} {
  func.func @tabular_mlp_kernel(%arg0: i32, %arg1: memref<8x128xf32, #tpu.memory_space<vmem>>, %arg2: memref<128x128xf32, #tpu.memory_space<vmem>>, %arg3: memref<128x128xf32, #tpu.memory_space<vmem>>, %arg4: memref<3x128xf32, #tpu.memory_space<vmem>>, %arg5: memref<128x128xf32, #tpu.memory_space<vmem>>, %arg6: memref<128x128xf32, #tpu.memory_space<vmem>>, %arg7: memref<3x128xf32, #tpu.memory_space<vmem>>, %arg8: memref<128x32xf32, #tpu.memory_space<vmem>>, %arg9: memref<1x32xf32, #tpu.memory_space<vmem>>, %arg10: memref<8x32xf32, #tpu.memory_space<vmem>>) attributes {dimension_semantics = [#tpu.dimension_semantics<parallel>], iteration_bounds = array<i64: 1>, scalar_prefetch = 0 : i64, scratch_operands = 0 : i64, tpu.core_type = #tpu.core_type<tc>, window_params = [{transform_indices = @transform_0, window_bounds = array<i64: 8, 128>}, {pipeline_mode = #tpu.pipeline_mode<synchronous>, transform_indices = @transform_1, window_bounds = array<i64: 128, 128>}, {pipeline_mode = #tpu.pipeline_mode<synchronous>, transform_indices = @transform_2, window_bounds = array<i64: 128, 128>}, {pipeline_mode = #tpu.pipeline_mode<synchronous>, transform_indices = @transform_3, window_bounds = array<i64: 3, 128>}, {pipeline_mode = #tpu.pipeline_mode<synchronous>, transform_indices = @transform_4, window_bounds = array<i64: 128, 128>}, {pipeline_mode = #tpu.pipeline_mode<synchronous>, transform_indices = @transform_5, window_bounds = array<i64: 128, 128>}, {pipeline_mode = #tpu.pipeline_mode<synchronous>, transform_indices = @transform_6, window_bounds = array<i64: 3, 128>}, {pipeline_mode = #tpu.pipeline_mode<synchronous>, transform_indices = @transform_7, window_bounds = array<i64: 128, 32>}, {pipeline_mode = #tpu.pipeline_mode<synchronous>, transform_indices = @transform_8, window_bounds = array<i64: 1, 32>}, {transform_indices = @transform_9, window_bounds = array<i64: 8, 32>}]} {
    %c0 = arith.constant 0 : index
    %c0_0 = arith.constant 0 : index
    %0 = vector.load %arg1[%c0, %c0_0] : memref<8x128xf32, #tpu.memory_space<vmem>>, vector<8x128xf32>
    %c0_1 = arith.constant 0 : index
    %c0_2 = arith.constant 0 : index
    %1 = vector.load %arg2[%c0_1, %c0_2] : memref<128x128xf32, #tpu.memory_space<vmem>>, vector<128x128xf32>
    %cst = arith.constant dense<0.000000e+00> : vector<8x128xf32>
    %2 = tpu.matmul %0, %1, %cst {dimension_numbers = #tpu.dot_dimension_numbers<[1], [0], [0], [1], [0, 0, 1, 1], [], []>} : vector<8x128xf32>, vector<128x128xf32>, vector<8x128xf32> -> vector<8x128xf32>
    %c0_3 = arith.constant 0 : index
    %c0_4 = arith.constant 0 : index
    %3 = vector.load %arg4[%c0_3, %c0_4] : memref<3x128xf32, #tpu.memory_space<vmem>>, vector<1x128xf32>
    %4 = vector.broadcast %3 : vector<1x128xf32> to vector<8x128xf32>
    %5 = arith.addf %2, %4 : vector<8x128xf32>
    %c0_5 = arith.constant 0 : index
    %c0_6 = arith.constant 0 : index
    %6 = vector.load %arg3[%c0_5, %c0_6] : memref<128x128xf32, #tpu.memory_space<vmem>>, vector<128x128xf32>
    %cst_7 = arith.constant dense<0.000000e+00> : vector<8x128xf32>
    %7 = tpu.matmul %5, %6, %cst_7 {dimension_numbers = #tpu.dot_dimension_numbers<[1], [0], [0], [1], [0, 0, 1, 1], [], []>} : vector<8x128xf32>, vector<128x128xf32>, vector<8x128xf32> -> vector<8x128xf32>
    %8 = arith.subf %5, %7 : vector<8x128xf32>
    %9 = arith.mulf %8, %8 : vector<8x128xf32>
    %c0_8 = arith.constant 0 : index
    %c0_9 = arith.constant 0 : index
    %10 = vector.load %arg3[%c0_8, %c0_9] : memref<128x128xf32, #tpu.memory_space<vmem>>, vector<128x128xf32>
    %cst_10 = arith.constant dense<0.000000e+00> : vector<8x128xf32>
    %11 = tpu.matmul %9, %10, %cst_10 {dimension_numbers = #tpu.dot_dimension_numbers<[1], [0], [0], [1], [0, 0, 1, 1], [], []>} : vector<8x128xf32>, vector<128x128xf32>, vector<8x128xf32> -> vector<8x128xf32>
    %cst_11 = arith.constant 9.99999974E-6 : f32
    %12 = vector.broadcast %cst_11 : f32 to vector<8x128xf32>
    %13 = arith.addf %11, %12 : vector<8x128xf32>
    %14 = math.rsqrt %13 : vector<8x128xf32>
    %15 = arith.mulf %8, %14 : vector<8x128xf32>
    %c1 = arith.constant 1 : index
    %c0_12 = arith.constant 0 : index
    %16 = vector.load %arg4[%c1, %c0_12] : memref<3x128xf32, #tpu.memory_space<vmem>>, vector<1x128xf32>
    %17 = vector.broadcast %16 : vector<1x128xf32> to vector<8x128xf32>
    %18 = arith.mulf %15, %17 : vector<8x128xf32>
    %c2 = arith.constant 2 : index
    %c0_13 = arith.constant 0 : index
    %19 = vector.load %arg4[%c2, %c0_13] : memref<3x128xf32, #tpu.memory_space<vmem>>, vector<1x128xf32>
    %20 = vector.broadcast %19 : vector<1x128xf32> to vector<8x128xf32>
    %21 = arith.addf %18, %20 : vector<8x128xf32>
    %cst_14 = arith.constant 0.000000e+00 : f32
    %22 = vector.broadcast %cst_14 : f32 to vector<8x128xf32>
    %23 = arith.maximumf %21, %22 : vector<8x128xf32>
    %c0_15 = arith.constant 0 : index
    %c0_16 = arith.constant 0 : index
    %24 = vector.load %arg5[%c0_15, %c0_16] : memref<128x128xf32, #tpu.memory_space<vmem>>, vector<128x128xf32>
    %cst_17 = arith.constant dense<0.000000e+00> : vector<8x128xf32>
    %25 = tpu.matmul %23, %24, %cst_17 {dimension_numbers = #tpu.dot_dimension_numbers<[1], [0], [0], [1], [0, 0, 1, 1], [], []>} : vector<8x128xf32>, vector<128x128xf32>, vector<8x128xf32> -> vector<8x128xf32>
    %c0_18 = arith.constant 0 : index
    %c0_19 = arith.constant 0 : index
    %26 = vector.load %arg7[%c0_18, %c0_19] : memref<3x128xf32, #tpu.memory_space<vmem>>, vector<1x128xf32>
    %27 = vector.broadcast %26 : vector<1x128xf32> to vector<8x128xf32>
    %28 = arith.addf %25, %27 : vector<8x128xf32>
    %c0_20 = arith.constant 0 : index
    %c0_21 = arith.constant 0 : index
    %29 = vector.load %arg6[%c0_20, %c0_21] : memref<128x128xf32, #tpu.memory_space<vmem>>, vector<128x128xf32>
    %cst_22 = arith.constant dense<0.000000e+00> : vector<8x128xf32>
    %30 = tpu.matmul %28, %29, %cst_22 {dimension_numbers = #tpu.dot_dimension_numbers<[1], [0], [0], [1], [0, 0, 1, 1], [], []>} : vector<8x128xf32>, vector<128x128xf32>, vector<8x128xf32> -> vector<8x128xf32>
    %31 = arith.subf %28, %30 : vector<8x128xf32>
    %32 = arith.mulf %31, %31 : vector<8x128xf32>
    %c0_23 = arith.constant 0 : index
    %c0_24 = arith.constant 0 : index
    %33 = vector.load %arg6[%c0_23, %c0_24] : memref<128x128xf32, #tpu.memory_space<vmem>>, vector<128x128xf32>
    %cst_25 = arith.constant dense<0.000000e+00> : vector<8x128xf32>
    %34 = tpu.matmul %32, %33, %cst_25 {dimension_numbers = #tpu.dot_dimension_numbers<[1], [0], [0], [1], [0, 0, 1, 1], [], []>} : vector<8x128xf32>, vector<128x128xf32>, vector<8x128xf32> -> vector<8x128xf32>
    %cst_26 = arith.constant 9.99999974E-6 : f32
    %35 = vector.broadcast %cst_26 : f32 to vector<8x128xf32>
    %36 = arith.addf %34, %35 : vector<8x128xf32>
    %37 = math.rsqrt %36 : vector<8x128xf32>
    %38 = arith.mulf %31, %37 : vector<8x128xf32>
    %c1_27 = arith.constant 1 : index
    %c0_28 = arith.constant 0 : index
    %39 = vector.load %arg7[%c1_27, %c0_28] : memref<3x128xf32, #tpu.memory_space<vmem>>, vector<1x128xf32>
    %40 = vector.broadcast %39 : vector<1x128xf32> to vector<8x128xf32>
    %41 = arith.mulf %38, %40 : vector<8x128xf32>
    %c2_29 = arith.constant 2 : index
    %c0_30 = arith.constant 0 : index
    %42 = vector.load %arg7[%c2_29, %c0_30] : memref<3x128xf32, #tpu.memory_space<vmem>>, vector<1x128xf32>
    %43 = vector.broadcast %42 : vector<1x128xf32> to vector<8x128xf32>
    %44 = arith.addf %41, %43 : vector<8x128xf32>
    %cst_31 = arith.constant 0.000000e+00 : f32
    %45 = vector.broadcast %cst_31 : f32 to vector<8x128xf32>
    %46 = arith.maximumf %44, %45 : vector<8x128xf32>
    %c0_32 = arith.constant 0 : index
    %c0_33 = arith.constant 0 : index
    %47 = vector.load %arg8[%c0_32, %c0_33] : memref<128x32xf32, #tpu.memory_space<vmem>>, vector<128x32xf32>
    %cst_34 = arith.constant dense<0.000000e+00> : vector<8x32xf32>
    %48 = tpu.matmul %46, %47, %cst_34 {dimension_numbers = #tpu.dot_dimension_numbers<[1], [0], [0], [1], [0, 0, 1, 1], [], []>} : vector<8x128xf32>, vector<128x32xf32>, vector<8x32xf32> -> vector<8x32xf32>
    %c0_35 = arith.constant 0 : index
    %c0_36 = arith.constant 0 : index
    %49 = vector.load %arg9[%c0_35, %c0_36] : memref<1x32xf32, #tpu.memory_space<vmem>>, vector<1x32xf32>
    %50 = vector.broadcast %49 : vector<1x32xf32> to vector<8x32xf32>
    %51 = arith.addf %48, %50 : vector<8x32xf32>
    %c0_37 = arith.constant 0 : index
    %c0_38 = arith.constant 0 : index
    %52 = vector.load %arg10[%c0_37, %c0_38] : memref<8x32xf32, #tpu.memory_space<vmem>>, vector<8x32xf32>
    tpu.vector_store %arg10[%c0_37, %c0_38], %51 {strides = array<i32>} : memref<8x32xf32, #tpu.memory_space<vmem>>, vector<8x32xf32>,
    return
  }
  func.func @transform_0(%arg0: i32) -> (i32, i32) {
    %c0_i32 = arith.constant 0 : i32
    %c0_i32_0 = arith.constant 0 : i32
    return %arg0, %c0_i32 : i32, i32
  }
  func.func @transform_1(%arg0: i32) -> (i32, i32) {
    %c0_i32 = arith.constant 0 : i32
    %c0_i32_0 = arith.constant 0 : i32
    %c0_i32_1 = arith.constant 0 : i32
    return %c0_i32, %c0_i32_0 : i32, i32
  }
  func.func @transform_2(%arg0: i32) -> (i32, i32) {
    %c0_i32 = arith.constant 0 : i32
    %c0_i32_0 = arith.constant 0 : i32
    %c0_i32_1 = arith.constant 0 : i32
    return %c0_i32, %c0_i32_0 : i32, i32
  }
  func.func @transform_3(%arg0: i32) -> (i32, i32) {
    %c0_i32 = arith.constant 0 : i32
    %c0_i32_0 = arith.constant 0 : i32
    %c0_i32_1 = arith.constant 0 : i32
    return %c0_i32, %c0_i32_0 : i32, i32
  }
  func.func @transform_4(%arg0: i32) -> (i32, i32) {
    %c0_i32 = arith.constant 0 : i32
    %c0_i32_0 = arith.constant 0 : i32
    %c0_i32_1 = arith.constant 0 : i32
    return %c0_i32, %c0_i32_0 : i32, i32
  }
  func.func @transform_5(%arg0: i32) -> (i32, i32) {
    %c0_i32 = arith.constant 0 : i32
    %c0_i32_0 = arith.constant 0 : i32
    %c0_i32_1 = arith.constant 0 : i32
    return %c0_i32, %c0_i32_0 : i32, i32
  }
  func.func @transform_6(%arg0: i32) -> (i32, i32) {
    %c0_i32 = arith.constant 0 : i32
    %c0_i32_0 = arith.constant 0 : i32
    %c0_i32_1 = arith.constant 0 : i32
    return %c0_i32, %c0_i32_0 : i32, i32
  }
  func.func @transform_7(%arg0: i32) -> (i32, i32) {
    %c0_i32 = arith.constant 0 : i32
    %c0_i32_0 = arith.constant 0 : i32
    %c0_i32_1 = arith.constant 0 : i32
    return %c0_i32, %c0_i32_0 : i32, i32
  }
  func.func @transform_8(%arg0: i32) -> (i32, i32) {
    %c0_i32 = arith.constant 0 : i32
    %c0_i32_0 = arith.constant 0 : i32
    %c0_i32_1 = arith.constant 0 : i32
    return %c0_i32, %c0_i32_0 : i32, i32
  }
  func.func @transform_9(%arg0: i32) -> (i32, i32) {
    %c0_i32 = arith.constant 0 : i32
    %c0_i32_0 = arith.constant 0 : i32
    return %arg0, %c0_i32 : i32, i32
  }
}

</mosaic_0001>

<bundles_post_ra>
// kernel: tpu_custom_call.1
= control target key start
LH: loop header
LB: loop body
LE: loop exit
PB: predicated region body
PF: predicated region fallthrough
CT: control target
= control target key end

     0   :  { %14 = vsyncpa [#allocation3], 0  ;;  %s681_s0 = inlined_call_operand.vmem [shape: f32[8,128], index: 0, kind: input, shape index: {}]   ;;  %s682_s1 = inlined_call_operand.vmem [shape: f32[128,128], index: 1, kind: input, shape index: {}]   ;;  %s683_s2 = inlined_call_operand.hbm [shape: f32[128,128], index: 2, kind: input, shape index: {}]   ;;  %s684_s3 = inlined_call_operand.vmem [shape: f32[3,128], index: 3, kind: input, shape index: {}]   ;;  %s685_s4 = inlined_call_operand.hbm [shape: f32[128,128], index: 4, kind: input, shape index: {}]   ;;  %s686_s5 = inlined_call_operand.hbm [shape: f32[128,128], index: 5, kind: input, shape index: {}]   ;;  %s687_s6 = inlined_call_operand.vmem [shape: f32[3,128], index: 6, kind: input, shape index: {}]   ;;  %s688_s7 = inlined_call_operand.vmem [shape: f32[128,32], index: 7, kind: input, shape index: {}]   ;;  %s689_s8 = inlined_call_operand.vmem [shape: f32[1,32], index: 8, kind: input, shape index: {}]   ;;  %s690_s9 = inlined_call_operand.hbm [shape: f32[8,32], index: 9, kind: output, shape index: {}]  }
   0x1   :  { %15 = vsyncpa [#allocation6], 0 }
   0x2   :  { %16 = vsyncpa [#allocation4], 0  ;;  %s40_s11 = sshll.u32 %s685_s4, 4  ;;  %s488_s12 = smov [#allocation5]   ;;  %s41_s11 = int_to_ptr.hbm [resolvable:$true] %s40_s11 }
   0x3   :  { %s42_s13 = sshll.u32 %s488_s12, 4  ;;  %s25_s16 = sshll.u32 %s683_s2, 4  ;;  %s43_s13 = int_to_ptr.vmem [resolvable:$true] %s42_s13  ;;  %s26_s16 = int_to_ptr.hbm [resolvable:$true] %s25_s16 }
   0x4   :  { %s489_s17 = smov 128   ;;  %s490_s18 = smov 8  }
   0x5   :  { %48 = dma.hbm_to_vmem [thread:$0]  %s41_s11, 2048, %s43_s13, [#allocation6], %s489_s17, %s489_s17, %s490_s18  }
   0x6   :  { %s491_s19 = smov [#allocation2]   ;;  %s53_s23 = sshll.u32 %s686_s5, 4  ;;  %s54_s23 = int_to_ptr.hbm [resolvable:$true] %s53_s23 }
   0x7   :  { %s27_s20 = sshll.u32 %s491_s19, 4  ;;  %s492_s4 = smov [#allocation7]   ;;  %s28_s20 = int_to_ptr.vmem [resolvable:$true] %s27_s20 }
   0x8   :  { %33 = dma.hbm_to_vmem [thread:$0]  %s26_s16, 2048, %s28_s20, [#allocation3], %s489_s17, %s489_s17, %s490_s18  }
   0x9   :  { %s55_s24 = sshll.u32 %s492_s4, 4  ;;  %s56_s24 = int_to_ptr.vmem [resolvable:$true] %s55_s24 }
   0xa   :  { %61 = dma.hbm_to_vmem [thread:$0]  %s54_s23, 2048, %s56_s24, [#allocation6], %s489_s17, %s489_s17, %s490_s18  }
   0xb   :  { %482 = dma.done.wait [#allocation3], 2048  }
   0xc   :  { %483 = vsyncadd [#allocation3], 4294965248 }
   0xd   :  { %484 = dma.done.wait [#allocation6], 4096  }
   0xe   :  { %485 = vsyncadd [#allocation6], 4294963200  ;;  %v96_v0 = vld [vmem:[%s682_s1 + $0x78] sm:$0xff]  ;;  %v95_v1 = vld [vmem:[%s682_s1 + $0x70] sm:$0xff]  ;;  %s493_s25 = smov [#allocation8]   ;;  %s358_s28 = sshll.u32 %s690_s9, 4  ;;  %s359_s28 = int_to_ptr.hbm [resolvable:$true] %s358_s28 }
   0xf   :  { %99 = vmatpush.msra.mxu0 %v96_v0  ;;  %v94_v2 = vld [vmem:[%s682_s1 + $0x68] sm:$0xff]  ;;  %v93_v3 = vld [vmem:[%s682_s1 + $0x60] sm:$0xff]  ;;  %v134_v4 = vld [vmem:[#allocation2 + $0x78] sm:$0xff]  ;;  %s356_s26 = sshll.u32 %s493_s25, 4  ;;  %vm349_vm6 = vcmask 261120   ;;  %s357_s26 = int_to_ptr.vmem [resolvable:$true] %s356_s26 }
  0x10   :  { %v92_v5 = vld [vmem:[%s682_s1 + $0x58] sm:$0xff]  ;;  %135 = vmatpush.msra.mxu1 %v134_v4  ;;  %v133_v6 = vld [vmem:[#allocation2 + $0x70] sm:$0xff]  ;;  %157 = vmatpush.msra.mxu2 %v134_v4  ;;  %v132_v7 = vld [vmem:[#allocation2 + $0x68] sm:$0xff] }
  0x11   :  { %100 = vmatpush.msra.mxu0 %v95_v1  ;;  %v91_v8 = vld [vmem:[%s682_s1 + $0x50] sm:$0xff]  ;;  %v90_v9 = vld [vmem:[%s682_s1 + $0x48] sm:$0xff]  ;;  %v131_v10 = vld [vmem:[#allocation2 + $0x60] sm:$0xff] }
  0x12   :  { %136 = vmatpush.msra.mxu1 %v133_v6  ;;  %158 = vmatpush.msra.mxu2 %v133_v6  ;;  %v89_v11 = vld [vmem:[%s682_s1 + $0x40] sm:$0xff]  ;;  %v130_v12 = vld [vmem:[#allocation2 + $0x58] sm:$0xff]  ;;  %v129_v13 = vld [vmem:[#allocation2 + $0x50] sm:$0xff] }
  0x13   :  { %101 = vmatpush.msra.mxu0 %v94_v2  ;;  %v88_v14 = vld [vmem:[%s682_s1 + $0x38] sm:$0xff]  ;;  %v128_v15 = vld [vmem:[#allocation2 + $0x48] sm:$0xff]  ;;  %v87_v16 = vld [vmem:[%s682_s1 + $0x30] sm:$0xff] }
  0x14   :  { %137 = vmatpush.msra.mxu1 %v132_v7  ;;  %159 = vmatpush.msra.mxu2 %v132_v7  ;;  %v127_v17 = vld [vmem:[#allocation2 + $0x40] sm:$0xff]  ;;  %v86_v18 = vld [vmem:[%s682_s1 + $0x28] sm:$0xff]  ;;  %v126_v19 = vld [vmem:[#allocation2 + $0x38] sm:$0xff] }
  0x15   :  { %102 = vmatpush.msra.mxu0 %v93_v3  ;;  %v85_v20 = vld [vmem:[%s682_s1 + $0x20] sm:$0xff]  ;;  %v125_v21 = vld [vmem:[#allocation2 + $0x30] sm:$0xff]  ;;  %v84_v22 = vld [vmem:[%s682_s1 + $0x18] sm:$0xff] }
  0x16   :  { %138 = vmatpush.msra.mxu1 %v131_v10  ;;  %160 = vmatpush.msra.mxu2 %v131_v10  ;;  %v124_v23 = vld [vmem:[#allocation2 + $0x28] sm:$0xff]  ;;  %v83_v24 = vld [vmem:[%s682_s1 + $0x10] sm:$0xff]  ;;  %v123_v25 = vld [vmem:[#allocation2 + $0x20] sm:$0xff] }
  0x17   :  { %103 = vmatpush.msra.mxu0 %v92_v5  ;;  %v82_v26 = vld [vmem:[%s682_s1 + $0x8] sm:$0xff]  ;;  %v122_v27 = vld [vmem:[#allocation2 + $0x18] sm:$0xff]  ;;  %v81_v28 = vld [vmem:[%s682_s1] sm:$0xff] }
  0x18   :  { %139 = vmatpush.msra.mxu1 %v130_v12  ;;  %161 = vmatpush.msra.mxu2 %v130_v12  ;;  %v80_v29 = vld [vmem:[%s681_s0] sm:$0xff]  ;;  %v121_v30 = vld [vmem:[#allocation2 + $0x10] sm:$0xff]  ;;  %v120_v31 = vld [vmem:[#allocation2 + $0x8] sm:$0xff] }
  0x19   :  { %104 = vmatpush.msra.mxu0 %v91_v8  ;;  %v119_v32 = vld [vmem:[#allocation2] sm:$0xff]  ;;  %v210_v36 = vld [vmem:[#allocation5 + $0x78] sm:$0xff]  ;;  %v209_v40 = vld [vmem:[#allocation5 + $0x70] sm:$0xff] }
  0x1a   :  { %140 = vmatpush.msra.mxu1 %v129_v13  ;;  %162 = vmatpush.msra.mxu2 %v129_v13  ;;  %v375_v33 = vld [vmem:[%s684_s3] ss:$0 sm:$0xff]  ;;  %v208_v41 = vld [vmem:[#allocation5 + $0x68] sm:$0xff]  ;;  %v206_v43 = vld [vmem:[#allocation5 + $0x58] sm:$0xff] }
  0x1b   :  { %105 = vmatpush.msra.mxu0 %v90_v9  ;;  %213 = vmatpush.msra.mxu3 %v210_v36  ;;  %v207_v42 = vld [vmem:[#allocation5 + $0x60] sm:$0xff]  ;;  %v205_v44 = vld [vmem:[#allocation5 + $0x50] sm:$0xff]  ;;  %v204_v45 = vld [vmem:[#allocation5 + $0x48] sm:$0xff] }
  0x1c   :  { %141 = vmatpush.msra.mxu1 %v128_v15  ;;  %163 = vmatpush.msra.mxu2 %v128_v15  ;;  %v203_v46 = vld [vmem:[#allocation5 + $0x40] sm:$0xff]  ;;  %v202_v47 = vld [vmem:[#allocation5 + $0x38] sm:$0xff]  ;;  %v201_v48 = vld [vmem:[#allocation5 + $0x30] sm:$0xff] }
  0x1d   :  { %106 = vmatpush.msra.mxu0 %v89_v11  ;;  %214 = vmatpush.msra.mxu3 %v209_v40  ;;  %v200_v49 = vld [vmem:[#allocation5 + $0x28] sm:$0xff]  ;;  %v199_v50 = vld [vmem:[#allocation5 + $0x20] sm:$0xff]  ;;  %v198_v51 = vld [vmem:[#allocation5 + $0x18] sm:$0xff] }
  0x1e   :  { %142 = vmatpush.msra.mxu1 %v127_v17  ;;  %164 = vmatpush.msra.mxu2 %v127_v17  ;;  %v197_v52 = vld [vmem:[#allocation5 + $0x10] sm:$0xff]  ;;  %v196_v53 = vld [vmem:[#allocation5 + $0x8] sm:$0xff]  ;;  %v195_v54 = vld [vmem:[#allocation5] sm:$0xff] }
  0x1f   :  { %107 = vmatpush.msra.mxu0 %v88_v14  ;;  %215 = vmatpush.msra.mxu3 %v208_v41  ;;  %v248_v55 = vld [vmem:[#allocation7 + $0x78] sm:$0xff]  ;;  %v247_v56 = vld [vmem:[#allocation7 + $0x70] sm:$0xff]  ;;  %v246_v57 = vld [vmem:[#allocation7 + $0x68] sm:$0xff] }
  0x20   :  { %143 = vmatpush.msra.mxu1 %v126_v19  ;;  %165 = vmatpush.msra.mxu2 %v126_v19  ;;  %v245_v60 = vld [vmem:[#allocation7 + $0x60] sm:$0xff]  ;;  %v244_v61 = vld [vmem:[#allocation7 + $0x58] sm:$0xff]  ;;  %v243_v62 = vld [vmem:[#allocation7 + $0x50] sm:$0xff] }
  0x21   :  { %108 = vmatpush.msra.mxu0 %v87_v16  ;;  %216 = vmatpush.msra.mxu3 %v207_v42  ;;  %v242_v63 = vld [vmem:[#allocation7 + $0x48] sm:$0xff]  ;;  %v241_v1 = vld [vmem:[#allocation7 + $0x40] sm:$0xff]  ;;  %v240_v3 = vld [vmem:[#allocation7 + $0x38] sm:$0xff] }
  0x22   :  { %144 = vmatpush.msra.mxu1 %v125_v21  ;;  %166 = vmatpush.msra.mxu2 %v125_v21  ;;  %v239_v5 = vld [vmem:[#allocation7 + $0x30] sm:$0xff]  ;;  %v238_v7 = vld [vmem:[#allocation7 + $0x28] sm:$0xff]  ;;  %v237_v9 = vld [vmem:[#allocation7 + $0x20] sm:$0xff] }
  0x23   :  { %109 = vmatpush.msra.mxu0 %v86_v18  ;;  %217 = vmatpush.msra.mxu3 %v206_v43  ;;  %v376_v11 = vld [vmem:[%s684_s3 + $0x1] ss:$0 sm:$0xff]  ;;  %v236_v12 = vld [vmem:[#allocation7 + $0x18] sm:$0xff]  ;;  %v377_v15 = vld [vmem:[%s684_s3 + $0x2] ss:$0 sm:$0xff] }
  0x24   :  { %145 = vmatpush.msra.mxu1 %v124_v23  ;;  %167 = vmatpush.msra.mxu2 %v124_v23  ;;  %v235_v16 = vld [vmem:[#allocation7 + $0x10] sm:$0xff]  ;;  %v233_v21 = vld [vmem:[#allocation7] sm:$0xff]  ;;  %v316_v36 = vld [vmem:[%s688_s7 + $0x38] sm:$0xff] }
  0x25   :  { %110 = vmatpush.msra.mxu0 %v85_v20  ;;  %218 = vmatpush.msra.mxu3 %v205_v44  ;;  %v234_v20 = vld [vmem:[#allocation7 + $0x8] sm:$0xff]  ;;  %v312_v40 = vld [vmem:[%s688_s7 + $0x18] sm:$0xff]  ;;  %v311_v41 = vld [vmem:[%s688_s7 + $0x10] sm:$0xff] }
  0x26   :  { %146 = vmatpush.msra.mxu1 %v123_v25  ;;  %168 = vmatpush.msra.mxu2 %v123_v25  ;;  %v324_v25 = vld [vmem:[%s688_s7 + $0x78] sm:$0xff]  ;;  %v310_v42 = vld [vmem:[%s688_s7 + $0x8] sm:$0xff]  ;;  %v309_v43 = vld [vmem:[%s688_s7] sm:$0xff] }
  0x27   :  { %111 = vmatpush.msra.mxu0 %v84_v22  ;;  %219 = vmatpush.msra.mxu3 %v204_v45  ;;  %v378_v22 = vld [vmem:[%s687_s6] ss:$0 sm:$0xff] }
  0x28   :  { %147 = vmatpush.msra.mxu1 %v122_v27  ;;  %169 = vmatpush.msra.mxu2 %v122_v27 }
  0x29   :  { %112 = vmatpush.msra.mxu0 %v83_v24  ;;  %220 = vmatpush.msra.mxu3 %v203_v46 }
  0x2a   :  { %148 = vmatpush.msra.mxu1 %v121_v30  ;;  %170 = vmatpush.msra.mxu2 %v121_v30  ;;  %v322_v30 = vld [vmem:[%s688_s7 + $0x68] sm:$0xff] }
  0x2b   :  { %113 = vmatpush.msra.mxu0 %v82_v26  ;;  %221 = vmatpush.msra.mxu3 %v202_v47 }
  0x2c   :  { %149 = vmatpush.msra.mxu1 %v120_v31  ;;  %171 = vmatpush.msra.mxu2 %v120_v31  ;;  %v321_v31 = vld [vmem:[%s688_s7 + $0x60] sm:$0xff] }
  0x2d   :  { %114 = vmatpush.msra.mxu0 %v81_v28  ;;  %222 = vmatpush.msra.mxu3 %v201_v48 }
  0x2e   :  { %115 = vmatmul.f32.vlgmr.msra.gmra.mxu0 %v80_v29  ;;  %150 = vmatpush.msra.mxu1 %v119_v32  ;;  %v323_v29 = vld [vmem:[%s688_s7 + $0x70] sm:$0xff] }
  0x2f   :  { %172 = vmatpush.msra.mxu2 %v119_v32  ;;  %223 = vmatpush.msra.mxu3 %v200_v49  ;;  %v320_v32 = vld [vmem:[%s688_s7 + $0x58] sm:$0xff] }
  0x30   :  { %249 = vmatpush.msrb.mxu0 %v248_v55  ;;  %271 = vmatpush.msrb.mxu1 %v248_v55  ;;  %v380_v55 = vld [vmem:[%s687_s6 + $0x2] ss:$0 sm:$0xff] }
  0x31   :  { %224 = vmatpush.msra.mxu3 %v199_v50  ;;  %329 = vmatpush.msrb.mxu2 %v324_v25 }
  0x32   :  { %250 = vmatpush.msrb.mxu0 %v247_v56  ;;  %272 = vmatpush.msrb.mxu1 %v247_v56 }
  0x33   :  { %225 = vmatpush.msra.mxu3 %v198_v51  ;;  %330 = vmatpush.msrb.mxu2 %v323_v29 }
  0x34   :  { %251 = vmatpush.msrb.mxu0 %v246_v57  ;;  %273 = vmatpush.msrb.mxu1 %v246_v57 }
  0x35   :  { %226 = vmatpush.msra.mxu3 %v197_v52  ;;  %331 = vmatpush.msrb.mxu2 %v322_v30  ;;  %v379_v52 = vld [vmem:[%s687_s6 + $0x1] ss:$0 sm:$0xff] }
  0x36   :  { %252 = vmatpush.msrb.mxu0 %v245_v60  ;;  %274 = vmatpush.msrb.mxu1 %v245_v60 }
  0x37   :  { %227 = vmatpush.msra.mxu3 %v196_v53  ;;  %332 = vmatpush.msrb.mxu2 %v321_v31 }
  0x38   :  { %253 = vmatpush.msrb.mxu0 %v244_v61  ;;  %275 = vmatpush.msrb.mxu1 %v244_v61 }
  0x39   :  { %228 = vmatpush.msra.mxu3 %v195_v54  ;;  %333 = vmatpush.msrb.mxu2 %v320_v32 }
  0x3a   :  { %254 = vmatpush.msrb.mxu0 %v243_v62  ;;  %276 = vmatpush.msrb.mxu1 %v243_v62 }
  0x3c   :  { %255 = vmatpush.msrb.mxu0 %v242_v63  ;;  %277 = vmatpush.msrb.mxu1 %v242_v63 }
  0x3e   :  { %256 = vmatpush.msrb.mxu0 %v241_v1  ;;  %278 = vmatpush.msrb.mxu1 %v241_v1 }
  0x40   :  { %257 = vmatpush.msrb.mxu0 %v240_v3  ;;  %279 = vmatpush.msrb.mxu1 %v240_v3 }
  0x42   :  { %258 = vmatpush.msrb.mxu0 %v239_v5  ;;  %280 = vmatpush.msrb.mxu1 %v239_v5 }
  0x44   :  { %259 = vmatpush.msrb.mxu0 %v238_v7  ;;  %281 = vmatpush.msrb.mxu1 %v238_v7 }
  0x46   :  { %260 = vmatpush.msrb.mxu0 %v237_v9  ;;  %282 = vmatpush.msrb.mxu1 %v237_v9 }
  0x48   :  { %261 = vmatpush.msrb.mxu0 %v236_v12  ;;  %283 = vmatpush.msrb.mxu1 %v236_v12 }
  0x4a   :  { %262 = vmatpush.msrb.mxu0 %v235_v16  ;;  %284 = vmatpush.msrb.mxu1 %v235_v16 }
  0x4c   :  { %263 = vmatpush.msrb.mxu0 %v234_v20  ;;  %285 = vmatpush.msrb.mxu1 %v234_v20 }
  0x4e   :  { %264 = vmatpush.msrb.mxu0 %v233_v21  ;;  %286 = vmatpush.msrb.mxu1 %v233_v21 }
  0xab   :  { %v116_v34 = vpop.f32.mrf.mxu0 }
  0xac   :  { %v117_v35 = vadd.f32 %v375_v33, %v116_v34  ;;  %v319_v33 = vld [vmem:[%s688_s7 + $0x50] sm:$0xff]  ;;  %v318_v34 = vld [vmem:[%s688_s7 + $0x48] sm:$0xff] }
  0xad   :  { %334 = vmatpush.msrb.mxu2 %v319_v33 }
  0xae   :  { %151 = vmatmul.f32.vlgmr.msra.gmra.mxu1 %v117_v35 }
  0xaf   :  { %335 = vmatpush.msrb.mxu2 %v318_v34 }
 0x12b   :  { %v152_v37 = vpop.f32.mrf.mxu1 }
 0x12c   :  { %v607_v38 = vsub.f32 %v117_v35, %v152_v37  ;;  %v317_v35 = vld [vmem:[%s688_s7 + $0x40] sm:$0xff]  ;;  %v315_v37 = vld [vmem:[%s688_s7 + $0x30] sm:$0xff] }
 0x12d   :  { %336 = vmatpush.msrb.mxu2 %v317_v35 }
 0x12e   :  { %v156_v39 = vmul.f32 %v607_v38, %v607_v38 }
 0x12f   :  { %337 = vmatpush.msrb.mxu2 %v316_v36 }
 0x130   :  { %173 = vmatmul.f32.vlgmr.msra.gmra.mxu2 %v156_v39  ;;  %v313_v39 = vld [vmem:[%s688_s7 + $0x20] sm:$0xff] }
 0x131   :  { %338 = vmatpush.msrb.mxu2 %v315_v37 }
 0x1b3   :  { %v174_v58 = vpop.f32.mrf.mxu2 }
 0x1b4   :  { %v175_v59 = vadd.f32 1e-05, %v174_v58 }
 0x1b6   :  { %382 = vrsqrt.f32 %v175_v59  ;;  %vm183_vm1 = vweird.f32 %v175_v59 }
 0x1bc   :  { %v383_v0 = vpop.eup %382 }
 0x1bd   :  { %v178_v2 = vmul.f32 %v383_v0, %v175_v59  ;;  %vm184_vm0 = vweird.f32 %v383_v0  ;;  %v381_v59 = vld [vmem:[%s689_s8] ss:$0 sm:$0xff] }
 0x1be   :  { %vm185_vm2 = vmor %vm183_vm1, %vm184_vm0 }
 0x1bf   :  { %v179_v4 = vmul.f32 %v383_v0, %v178_v2 }
 0x1c1   :  { %v180_v6 = vmul.f32 0.5, %v179_v4 }
 0x1c3   :  { %v181_v8 = vsub.f32 1.5, %v180_v6 }
 0x1c5   :  { %v182_v10 = vmul.f32 %v383_v0, %v181_v8 }
 0x1c7   :  { %v186_v13 = vsel %vm185_vm2, %v383_v0, %v182_v10 }
 0x1c8   :  { %v187_v14 = vmul.f32 %v186_v13, %v607_v38  ;;  %v314_v38 = vld [vmem:[%s688_s7 + $0x28] sm:$0xff] }
 0x1c9   :  { %339 = vmatpush.msrb.mxu2 %v314_v38 }
 0x1ca   :  { %v190_v17 = vmul.f32 %v376_v11, %v187_v14 }
 0x1cb   :  { %340 = vmatpush.msrb.mxu2 %v313_v39 }
 0x1cc   :  { %v193_v18 = vadd.f32 %v377_v15, %v190_v17 }
 0x1cd   :  { %341 = vmatpush.msrb.mxu2 %v312_v40 }
 0x1ce   :  { %v194_v19 = vmax.f32 %v193_v18, 0.0 }
 0x1cf   :  { %342 = vmatpush.msrb.mxu2 %v311_v41 }
 0x1d0   :  { %229 = vmatmul.f32.vlgmr.msra.gmra.mxu3 %v194_v19 }
 0x1d1   :  { %343 = vmatpush.msrb.mxu2 %v310_v42 }
 0x1d3   :  { %344 = vmatpush.msrb.mxu2 %v309_v43 }
 0x253   :  { %v230_v23 = vpop.f32.mrf.mxu3 }
 0x254   :  { %v231_v24 = vadd.f32 %v378_v22, %v230_v23 }
 0x256   :  { %265 = vmatmul.f32.vlgmr.msrb.gmra.mxu0 %v231_v24 }
 0x2d3   :  { %v266_v26 = vpop.f32.mrf.mxu0 }
 0x2d4   :  { %v269_v27 = vsub.f32 %v231_v24, %v266_v26 }
 0x2d6   :  { %v270_v28 = vmul.f32 %v269_v27, %v269_v27 }
 0x2d8   :  { %287 = vmatmul.f32.vlgmr.msrb.gmra.mxu1 %v270_v28 }
 0x355   :  { %v288_v44 = vpop.f32.mrf.mxu1 }
 0x356   :  { %v289_v45 = vadd.f32 1e-05, %v288_v44 }
 0x358   :  { %384 = vrsqrt.f32 %v289_v45  ;;  %vm297_vm4 = vweird.f32 %v289_v45 }
 0x35e   :  { %v385_v46 = vpop.eup %384 }
 0x35f   :  { %v292_v47 = vmul.f32 %v385_v46, %v289_v45  ;;  %vm298_vm3 = vweird.f32 %v385_v46 }
 0x360   :  { %vm299_vm5 = vmor %vm297_vm4, %vm298_vm3 }
 0x361   :  { %v293_v48 = vmul.f32 %v385_v46, %v292_v47 }
 0x363   :  { %v294_v49 = vmul.f32 0.5, %v293_v48 }
 0x365   :  { %v295_v50 = vsub.f32 1.5, %v294_v49 }
 0x367   :  { %v296_v51 = vmul.f32 %v385_v46, %v295_v50 }
 0x369   :  { %v300_v53 = vsel %vm299_vm5, %v385_v46, %v296_v51 }
 0x36a   :  { %v301_v54 = vmul.f32 %v300_v53, %v269_v27 }
 0x36c   :  { %v304_v56 = vmul.f32 %v379_v52, %v301_v54 }
 0x36e   :  { %v307_v57 = vadd.f32 %v380_v55, %v304_v56 }
 0x370   :  { %v308_v58 = vmax.f32 %v307_v57, 0.0 }
 0x372   :  { %345 = vmatmul.f32.vlgmr.msrb.gmra.mxu2 %v308_v58 }
 0x3f5   :  { %v346_v60 = vpop.f32.mrf.mxu2 }
 0x3f6   :  { %v347_v61 = vadd.f32 %v381_v59, %v346_v60 }
 0x3f8   :  { %350 = vst.msk [vmem:[#allocation8] sm:$0xff] %vm349_vm6, %v347_v61 }
 0x3f9   :  { %361 = dma.vmem_to_hbm [thread:$0]  %s357_s26, 128, %s359_s28, [#allocation4]  }
 0x3fa   :  { %486 = dma.done.wait [#allocation4], 128  }
 0x3fb   :  { %487 = vsyncadd [#allocation4], 4294967168 }
 0x3fc   :  { %366 = vsyncpa [#allocation3], 1 }
 0x3fd   :  { %367 = vsyncpa [#allocation6], 1 }
 0x3fe   :  { %368 = vsyncpa [#allocation4], 1 }

</bundles_post_ra>
